<compile_context>
chip_gen: v7x
topology: tpu7x:2x2x1
jax: 0.10.0
libtpu: 0.0.40
codegen_flags: <defaults>
</compile_context>

<pallas_src>
import jax
import jax.numpy as jnp
from jax.experimental import pallas as pl
from jax.experimental.pallas import tpu as pltpu


def _round_up(x, m):
    return ((x + m - 1) // m) * m


def mlp_kernel(x_ref, w1_ref, b1_ref, w2_ref, b2_ref, w3_ref, b3_ref, o_ref):
    # x_ref : (D, TB) bf16          w1_ref: (8, D)  bf16
    # w2_ref: (20, 8) bf16          w3_ref: (20, 1) f32 weight column
    # b1/b2 : (out, 1) f32 (VMEM)   b3_ref: (1,)    f32 (SMEM scalar)
    # Layer 1 (MXU, bf16 operands, f32 accumulate): (8, D) @ (D, TB) -> (8, TB)
    h1 = jnp.dot(w1_ref[...], x_ref[...], preferred_element_type=jnp.float32)
    h1 = jnp.maximum(h1 + b1_ref[...], 0.0)
    # Layer 2 (MXU, bf16 operands): (20, 8) @ (8, TB) -> (20, TB)
    h2 = jnp.dot(w2_ref[...], h1.astype(jnp.bfloat16),
                 preferred_element_type=jnp.float32)
    h2 = jnp.maximum(h2 + b2_ref[...], 0.0)
    # Layer 3 off the MXU (vex-slot relief): VPU broadcast-multiply by the
    # (20, 1) weight column, XLU sublane-sum over the 20 rows -> (1, TB),
    # then bias + ReLU on the VPU in f32.
    h3 = jnp.sum(h2 * w3_ref[...], axis=0, keepdims=True) + b3_ref[0]
    o_ref[...] = jnp.maximum(h3, 0.0).astype(o_ref.dtype)


def _choose_tile_b(B, D, *, vmem_budget_bytes=24 * 1024 * 1024, max_tile=64 * 1024):
    """Largest lane tile that keeps double-buffered traffic inside a v7x-safe
    VMEM budget, while leaving >= 2 grid steps so the 'parallel' batch axis can
    split across v7x's two TensorCores (no-op on single-TC v5e/v6e)."""
    # Per-lane VMEM bytes: double-buffered bf16 x tile (2*2*D) + double-buffered
    # f32 output (2*4) + ~256 B headroom for the f32/bf16 intermediates
    # (8- and 20-row activations).
    per_lane = 4 * D + 8 + 256
    tb = max(128, min(vmem_budget_bytes // per_lane, max_tile))
    tb = (tb // 128) * 128
    tb = min(tb, _round_up(B, 128))            # never exceed the (padded) batch
    if B > 128:                                # keep >= 2 grid steps when possible
        tb = min(tb, _round_up((B + 1) // 2, 128))
    return max(128, tb)


def mlp_regressor_forward(x, params, *, tile_b=None):
    """x: (B, dim_input) float32 -> (B, 1) float32, matching the PyTorch module."""
    B, D = x.shape
    tb = tile_b if tile_b is not None else _choose_tile_b(B, D)
    assert tb % 128 == 0

    # Feature-major / batch-on-lanes layout; the bf16 cast fuses into the single
    # transpose (one XLA op, no jnp.pad pass).  Pipelines that can cache x as a
    # (D, B) bf16 array should pass that in directly and skip this transpose.
    xt = jnp.transpose(x).astype(jnp.bfloat16)            # (D, B)

    w1 = params["w1"].astype(jnp.bfloat16)                # (8, D)   bf16 for MXU
    b1 = params["b1"]                                      # (8, 1)   f32
    w2 = params["w2"].astype(jnp.bfloat16)                 # (20, 8)  bf16 for MXU
    b2 = params["b2"]                                      # (20, 1)  f32
    w3 = jnp.transpose(params["w3"])                       # (20, 1)  f32 column (VPU path)
    b3 = params["b3"].reshape((1,))                        # (1,)     f32 SMEM scalar

    grid = (pl.cdiv(B, tb),)
    out = pl.pallas_call(
        mlp_kernel,
        out_shape=jax.ShapeDtypeStruct((1, B), jnp.float32),
        grid_spec=pltpu.PrefetchScalarGridSpec(
            num_scalar_prefetch=0,
            grid=grid,
            in_specs=[
                pl.BlockSpec((D, tb), lambda i: (0, i)),          # streamed x^T tile
                pl.BlockSpec((8, D), lambda i: (0, 0)),           # grid-invariant weights
                pl.BlockSpec((8, 1), lambda i: (0, 0)),
                pl.BlockSpec((20, 8), lambda i: (0, 0)),
                pl.BlockSpec((20, 1), lambda i: (0, 0)),
                pl.BlockSpec((20, 1), lambda i: (0, 0)),
                pl.BlockSpec(memory_space=pltpu.MemorySpace.SMEM),  # scalar fc4 bias
            ],
            out_specs=pl.BlockSpec((1, tb), lambda i: (0, i)),    # lane-dense output
        ),
        compiler_params=pltpu.CompilerParams(
            dimension_semantics=("parallel",),        # megacore sharding on v7x
            vmem_limit_bytes=48 * 1024 * 1024,        # < v7x's 64 MiB physical VMEM
        ),
    )(xt, w1, b1, w2, b2, w3, b3)

    # Transpose back to the PyTorch-style (B, 1) output (OOB lanes of the last
    # grid block were masked on store, so no slicing is needed).
    return jnp.transpose(out)


def init_params(key, dim_input):
    """PyTorch nn.Linear default init: U[-1/sqrt(fan_in), 1/sqrt(fan_in)]; W is (out, in)."""
    keys = jax.random.split(key, 6)

    def lin(kw, kb, fan_in, fan_out):
        bound = 1.0 / jnp.sqrt(jnp.float32(fan_in))
        w = jax.random.uniform(kw, (fan_out, fan_in), jnp.float32, -bound, bound)
        b = jax.random.uniform(kb, (fan_out, 1), jnp.float32, -bound, bound)
        return w, b

    w1, b1 = lin(keys[0], keys[1], dim_input, 8)
    w2, b2 = lin(keys[2], keys[3], 8, 20)
    w3, b3 = lin(keys[4], keys[5], 20, 1)
    return {"w1": w1, "b1": b1, "w2": w2, "b2": b2, "w3": w3, "b3": b3}


def mlp_reference(x, params):
    """Plain-JAX reference matching the kernel's numerics: bf16-rounded operands
    for the layer-1/2 MXU dots (f32 accumulation), f32 math for layer 3."""
    f32 = jnp.float32
    xq = x.astype(jnp.bfloat16).astype(f32)
    w1 = params["w1"].astype(jnp.bfloat16).astype(f32)
    h = jnp.maximum(xq @ w1.T + params["b1"].T, 0.0)
    w2 = params["w2"].astype(jnp.bfloat16).astype(f32)
    h = jnp.maximum(h.astype(jnp.bfloat16).astype(f32) @ w2.T + params["b2"].T, 0.0)
    h = jnp.maximum(h @ params["w3"].T + params["b3"].T, 0.0)
    return h


if __name__ == "__main__":
    key = jax.random.PRNGKey(0)
    k_x, k_p = jax.random.split(key)

    batch = 8
    dim_input = 16
    x = jax.random.normal(k_x, (batch, dim_input), jnp.float32)
    params = init_params(k_p, dim_input)

    out = mlp_regressor_forward(x, params)
    out = jax.block_until_ready(out)

    ref = mlp_reference(x, params)
    assert out.shape == (batch, 1), out.shape
    assert jnp.allclose(out, ref, atol=1e-3, rtol=1e-3), "Pallas kernel mismatch vs reference"

    print("KERNEL_OK")
</pallas_src>

<mosaic_0001>
module attributes {stable_mosaic.version = 11 : i64} {
  func.func @mlp_kernel(%arg0: i32, %arg1: memref<16x128xbf16, #tpu.memory_space<vmem>>, %arg2: memref<8x16xbf16, #tpu.memory_space<vmem>>, %arg3: memref<8x1xf32, #tpu.memory_space<vmem>>, %arg4: memref<20x8xbf16, #tpu.memory_space<vmem>>, %arg5: memref<20x1xf32, #tpu.memory_space<vmem>>, %arg6: memref<20x1xf32, #tpu.memory_space<vmem>>, %arg7: memref<1xf32, #tpu.memory_space<smem>>, %arg8: memref<1x128xf32, #tpu.memory_space<vmem>>) attributes {dimension_semantics = [#tpu.dimension_semantics<parallel>], iteration_bounds = array<i64: 1>, scalar_prefetch = 0 : i64, scratch_operands = 0 : i64, tpu.core_type = #tpu.core_type<tc>, window_params = [{transform_indices = @transform_0, window_bounds = array<i64: 16, 128>}, {pipeline_mode = #tpu.pipeline_mode<synchronous>, transform_indices = @transform_1, window_bounds = array<i64: 8, 16>}, {pipeline_mode = #tpu.pipeline_mode<synchronous>, transform_indices = @transform_2, window_bounds = array<i64: 8, 1>}, {pipeline_mode = #tpu.pipeline_mode<synchronous>, transform_indices = @transform_3, window_bounds = array<i64: 20, 8>}, {pipeline_mode = #tpu.pipeline_mode<synchronous>, transform_indices = @transform_4, window_bounds = array<i64: 20, 1>}, {pipeline_mode = #tpu.pipeline_mode<synchronous>, transform_indices = @transform_5, window_bounds = array<i64: 20, 1>}, {transform_indices = @transform_6, window_bounds = array<i64: 1>}, {transform_indices = @transform_7, window_bounds = array<i64: 1, 128>}]} {
    %c0 = arith.constant 0 : index
    %c0_0 = arith.constant 0 : index
    %0 = vector.load %arg2[%c0, %c0_0] : memref<8x16xbf16, #tpu.memory_space<vmem>>, vector<8x16xbf16>
    %c0_1 = arith.constant 0 : index
    %c0_2 = arith.constant 0 : index
    %1 = vector.load %arg1[%c0_1, %c0_2] : memref<16x128xbf16, #tpu.memory_space<vmem>>, vector<16x128xbf16>
    %cst = arith.constant dense<0.000000e+00> : vector<8x128xf32>
    %2 = tpu.matmul %0, %1, %cst {dimension_numbers = #tpu.dot_dimension_numbers<[1], [0], [0], [1], [0, 0, 1, 1], [], []>} : vector<8x16xbf16>, vector<16x128xbf16>, vector<8x128xf32> -> vector<8x128xf32>
    %c0_3 = arith.constant 0 : index
    %c0_4 = arith.constant 0 : index
    %3 = vector.load %arg3[%c0_3, %c0_4] : memref<8x1xf32, #tpu.memory_space<vmem>>, vector<8x1xf32>
    %4 = vector.broadcast %3 : vector<8x1xf32> to vector<8x128xf32>
    %5 = arith.addf %2, %4 : vector<8x128xf32>
    %cst_5 = arith.constant 0.000000e+00 : f32
    %6 = vector.broadcast %cst_5 : f32 to vector<8x128xf32>
    %7 = arith.maximumf %5, %6 : vector<8x128xf32>
    %c0_6 = arith.constant 0 : index
    %c0_7 = arith.constant 0 : index
    %8 = vector.load %arg4[%c0_6, %c0_7] : memref<20x8xbf16, #tpu.memory_space<vmem>>, vector<20x8xbf16>
    %9 = arith.truncf %7 : vector<8x128xf32> to vector<8x128xbf16>
    %cst_8 = arith.constant dense<0.000000e+00> : vector<20x128xf32>
    %10 = tpu.matmul %8, %9, %cst_8 {dimension_numbers = #tpu.dot_dimension_numbers<[1], [0], [0], [1], [0, 0, 1, 1], [], []>} : vector<20x8xbf16>, vector<8x128xbf16>, vector<20x128xf32> -> vector<20x128xf32>
    %c0_9 = arith.constant 0 : index
    %c0_10 = arith.constant 0 : index
    %11 = vector.load %arg5[%c0_9, %c0_10] : memref<20x1xf32, #tpu.memory_space<vmem>>, vector<20x1xf32>
    %12 = vector.broadcast %11 : vector<20x1xf32> to vector<20x128xf32>
    %13 = arith.addf %10, %12 : vector<20x128xf32>
    %cst_11 = arith.constant 0.000000e+00 : f32
    %14 = vector.broadcast %cst_11 : f32 to vector<20x128xf32>
    %15 = arith.maximumf %13, %14 : vector<20x128xf32>
    %c0_12 = arith.constant 0 : index
    %c0_13 = arith.constant 0 : index
    %16 = vector.load %arg6[%c0_12, %c0_13] : memref<20x1xf32, #tpu.memory_space<vmem>>, vector<20x1xf32>
    %17 = vector.broadcast %16 : vector<20x1xf32> to vector<20x128xf32>
    %18 = arith.mulf %15, %17 : vector<20x128xf32>
    %cst_14 = arith.constant dense<0.000000e+00> : vector<128xf32>
    %19 = vector.multi_reduction <add>, %18, %cst_14 [0] : vector<20x128xf32> to vector<128xf32>
    %20 = vector.shape_cast %19 : vector<128xf32> to vector<1x128xf32>
    %c0_15 = arith.constant 0 : index
    %21 = memref.load %arg7[%c0_15] : memref<1xf32, #tpu.memory_space<smem>>
    %22 = vector.broadcast %21 : f32 to vector<1x128xf32>
    %23 = arith.addf %20, %22 : vector<1x128xf32>
    %cst_16 = arith.constant 0.000000e+00 : f32
    %24 = vector.broadcast %cst_16 : f32 to vector<1x128xf32>
    %25 = arith.maximumf %23, %24 : vector<1x128xf32>
    %c0_17 = arith.constant 0 : index
    %c0_18 = arith.constant 0 : index
    %26 = vector.load %arg8[%c0_17, %c0_18] : memref<1x128xf32, #tpu.memory_space<vmem>>, vector<1x128xf32>
    tpu.vector_store %arg8[%c0_17, %c0_18], %25 {strides = array<i32>} : memref<1x128xf32, #tpu.memory_space<vmem>>, vector<1x128xf32>,
    return
  }
  func.func @transform_0(%arg0: i32) -> (i32, i32) {
    %c0_i32 = arith.constant 0 : i32
    %c0_i32_0 = arith.constant 0 : i32
    return %c0_i32, %arg0 : i32, i32
  }
  func.func @transform_1(%arg0: i32) -> (i32, i32) {
    %c0_i32 = arith.constant 0 : i32
    %c0_i32_0 = arith.constant 0 : i32
    %c0_i32_1 = arith.constant 0 : i32
    return %c0_i32, %c0_i32_0 : i32, i32
  }
  func.func @transform_2(%arg0: i32) -> (i32, i32) {
    %c0_i32 = arith.constant 0 : i32
    %c0_i32_0 = arith.constant 0 : i32
    %c0_i32_1 = arith.constant 0 : i32
    return %c0_i32, %c0_i32_0 : i32, i32
  }
  func.func @transform_3(%arg0: i32) -> (i32, i32) {
    %c0_i32 = arith.constant 0 : i32
    %c0_i32_0 = arith.constant 0 : i32
    %c0_i32_1 = arith.constant 0 : i32
    return %c0_i32, %c0_i32_0 : i32, i32
  }
  func.func @transform_4(%arg0: i32) -> (i32, i32) {
    %c0_i32 = arith.constant 0 : i32
    %c0_i32_0 = arith.constant 0 : i32
    %c0_i32_1 = arith.constant 0 : i32
    return %c0_i32, %c0_i32_0 : i32, i32
  }
  func.func @transform_5(%arg0: i32) -> (i32, i32) {
    %c0_i32 = arith.constant 0 : i32
    %c0_i32_0 = arith.constant 0 : i32
    %c0_i32_1 = arith.constant 0 : i32
    return %c0_i32, %c0_i32_0 : i32, i32
  }
  func.func @transform_6(%arg0: i32) -> i32 {
    %c0_i32 = arith.constant 0 : i32
    %c0_i32_0 = arith.constant 0 : i32
    return %c0_i32 : i32
  }
  func.func @transform_7(%arg0: i32) -> (i32, i32) {
    %c0_i32 = arith.constant 0 : i32
    %c0_i32_0 = arith.constant 0 : i32
    return %c0_i32, %arg0 : i32, i32
  }
}

</mosaic_0001>

<bundles_post_ra>
// kernel: tpu_custom_call.1
= control target key start
LH: loop header
LB: loop body
LE: loop exit
PB: predicated region body
PF: predicated region fallthrough
CT: control target
= control target key end

     0   :  { %v287_v1 = vmov 0.0   ;;  %vm288_vm0 = vmmov 0   ;;  %vm44_vm1 = vcmask 130048   ;;  %v289_v4 = vmov 0   ;;  %s384_s0 = inlined_call_operand.vmem [shape: bf16[16,8], index: 0, kind: input, shape index: {}]   ;;  %s385_s1 = inlined_call_operand.vmem [shape: bf16[8,16], index: 1, kind: input, shape index: {}]   ;;  %s386_s2 = inlined_call_operand.vmem [shape: f32[8,1], index: 2, kind: input, shape index: {}]   ;;  %s387_s3 = inlined_call_operand.vmem [shape: bf16[20,8], index: 3, kind: input, shape index: {}]   ;;  %s388_s4 = inlined_call_operand.vmem [shape: f32[20,1], index: 4, kind: input, shape index: {}]   ;;  %s389_s5 = inlined_call_operand.vmem [shape: f32[20,1], index: 5, kind: input, shape index: {}]   ;;  %s390_s6 = inlined_call_operand.<no memory space> [shape: f32[1], index: 6, kind: input, shape index: {}]   ;;  %s391_s7 = inlined_call_operand.hbm [shape: f32[1,8], index: 7, kind: output, shape index: {}]  }
   0x1   :  { %v260_v0 = vld [vmem:[%s384_s0] sm:$0xff]   ;;  %241 = vmatprep.subr.bf16.mxu0 %v287_v1  ;;  %243 = vmatprep.mubr.msk.bf16.mxu0 %vm288_vm0, %v287_v1 }
   0x2   :  { %v32_v2 = vld [vmem:[%s386_s2] sm:$0xff]  ;;  %242 = vmatpush3.bf16.msra.mxu0 %v260_v0  ;;  %258 = vset.pattern.permute.xlu0 %v289_v4 }
   0x3   :  { %v29_v3 = vld [vmem:[%s385_s1] sm:$0xf]  ;;  %259 = vset.pattern.permute.xlu1 %v289_v4  ;;  %35 = vperm.xlu0 %258, %v32_v2  }
   0x4   :  { %13 = vsyncpa [#allocation4], 0  ;;  %v93_v5 = vld [vmem:[%s388_s4] sm:$0xff]  ;;  %v183_v7 = vld [vmem:[%s389_s5 + $0x10] sm:$0xf]  ;;  %vm119_vm2 = vcmask 64512   ;;  %v212_v49 = vstv %s390_s6 }
   0x5   :  { %244 = vmatmul.mubr.msk.bf16.vlgmr.msra.gmra.mrb[0].mxu0 %vm44_vm1, %v29_v3  ;;  %v181_v6 = vld [vmem:[%s389_s5] sm:$0xff]  ;;  %v94_v9 = vld [vmem:[%s388_s4 + $0x8] sm:$0xff]  ;;  %v95_v10 = vld [vmem:[%s388_s4 + $0x10] sm:$0xf]  ;;  %vm126_vm3 = vcmask 1043456   ;;  %s290_s19 = smov [#allocation3]  }
   0x6   :  { %v261_v8 = vld [vmem:[%s387_s3] sm:$0xff]   ;;  %103 = vperm.xlu1 %259, %v94_v9   ;;  %v182_v11 = vld [vmem:[%s389_s5 + $0x8] sm:$0xff]  ;;  %s222_s20 = sshll.u32 %s290_s19, 4  ;;  %s223_s20 = int_to_ptr.vmem [resolvable:$true] %s222_s20 }
   0x7   :  { %98 = vperm.xlu0 %258, %v93_v5   ;;  %249 = vmatprep.mubr.msk.bf16.mxu1 %vm119_vm2, %v261_v8  ;;  %v262_v21 = vld [vmem:[%s387_s3 + $0x8] ss:$0 sps:$4 sm:$0x33]   ;;  %s263_s21 = scalar_lea.vmem %s223_s20, 16  ;;  %s267_s22 = scalar_lea.vmem %s223_s20, 32 }
   0x8   :  { %p264_p0 = scmp.ne.s32.totalorder %s223_s20, %s263_s21  ;;  %p268_p1 = scmp.lt.s32.totalorder %s223_s20, %s223_s20 }
   0x9   :  { %p269_p2 = scmp.lt.s32.totalorder %s267_s22, %s263_s21 }
   0xa   :  { %108 = vperm.xlu1 %259, %v95_v10  }
   0xb   :  { %186 = vperm.xlu0 %258, %v181_v6   ;;  %p270_p3 = por %p269_p2, %p268_p1 }
   0xd   :  { %p271_p4 = pnand %p270_p3, %p264_p0 }
   0xe   :  { %191 = vperm.xlu1 %259, %v182_v11  }
   0xf   :  { %196 = vperm.xlu0 %258, %v183_v7  }
  0x82   :  { %v36_v12 = vpop.permute.xlu0 %35 }
  0x85   :  { %v104_v23 = vpop.permute.xlu1 %103 }
  0x86   :  { %v99_v22 = vpop.permute.xlu0 %98 }
  0x89   :  { %v109_v25 = vpop.permute.xlu1 %108 }
  0x8a   :  { %v187_v24 = vpop.permute.xlu0 %186 }
  0x8d   :  { %v192_v37 = vpop.permute.xlu1 %191 }
  0x8e   :  { %v197_v35 = vpop.permute.xlu0 %196 }
  0xd8   :  { %v82_v13 = vpop.f32.mrb[0].mxu0 }
  0xd9   :  { %v83_v14 = vadd.f32 %v82_v13, %v36_v12  ;;  %v245_v15 = vpop.f32.mrb[1].mxu0 }
  0xda   :  { %v85_v16 = vpop.f32.mrb[2].mxu0 }
  0xdb   :  { %v88_v17 = vmax.f32 %v83_v14, 0.0  ;;  %v246_v18 = vpop.f32.mrb[3].mxu0 }
  0xdd   :  { %v92_v19 = vpack.c.bf16 %v88_v17, %v88_v17 }
  0xdf   :  { %253 = vmatprep.subr.msk.bf16.mxu1 %vm126_vm3, %v92_v19  ;;  %v128_v20 = vsel %vm126_vm3, %v92_v19, 0 }
  0xe0   :  { %248 = vmatpush3.bf16.msra.mxu1 %v128_v20 }
  0xe3   :  { %250 = vmatmul.mubr.msk.bf16.vlgmr.msra.gmra.mrb[0].mxu1 %vm119_vm2, %v262_v21 }
 0x1b6   :  { %v251_v26 = vpop.f32.mrb[0].mxu1 }
 0x1b7   :  { %v173_v27 = vadd.f32 %v251_v26, %v109_v25  ;;  %v164_v28 = vpop.f32.mrb[1].mxu1 }
 0x1b8   :  { %v165_v29 = vadd.f32 %v164_v28, %v99_v22  ;;  %v252_v30 = vpop.f32.mrb[2].mxu1 }
 0x1b9   :  { %v180_v31 = vmax.f32 %v173_v27, 0.0  ;;  %v167_v32 = vpop.f32.mrb[3].mxu1 }
 0x1ba   :  { %v178_v33 = vmax.f32 %v165_v29, 0.0  ;;  %v168_v34 = vadd.f32 %v167_v32, %v104_v23 }
 0x1bb   :  { %v201_v38 = vmul.f32 %v197_v35, %v180_v31 }
 0x1bc   :  { %v179_v36 = vmax.f32 %v168_v34, 0.0  ;;  %v199_v39 = vmul.f32 %v187_v24, %v178_v33 }
 0x1bd   :  { %v203_v42 = vsel %vm126_vm3, %v201_v38, 0.0 }
 0x1be   :  { %v200_v40 = vmul.f32 %v192_v37, %v179_v36 }
 0x1c0   :  { %v202_v41 = vadd.f32 %v200_v40, %v199_v39 }
 0x1c2   :  { %v204_v43 = vadd.f32 %v203_v42, %v202_v41 }
 0x1c4   :  { %v205_v44 = vrot.slane %v204_v43, 4 }
 0x1c6   :  { %v206_v45 = vadd.f32 %v205_v44, %v204_v43 }
 0x1c8   :  { %v207_v46 = vrot.slane %v206_v45, 2 }
 0x1ca   :  { %v208_v47 = vadd.f32 %v207_v46, %v206_v45 }
 0x1cc   :  { %v209_v48 = vrot.slane %v208_v47, 1 }
 0x1ce   :  { %v210_v50 = vadd.f32 %v209_v48, %v208_v47 }
 0x1d0   :  { %v213_v51 = vadd.f32 %v212_v49, %v210_v50 }
 0x1d2   :  { %v214_v52 = vmax.f32 %v213_v51, 0.0 }
 0x1d4   :  { %215 = vst [vmem:[#allocation3] sm:$0x1] %v214_v52 }
 0x1d5   :  { %274 = shalt.err (!%p271_p4)
}
 0x1d6   :  { %s275_s25 = scalar_lea.hbm %s391_s7, 16 }
 0x1d7   :  { %p276_p5 = scmp.ne.s32.totalorder %s391_s7, %s275_s25  ;;  %p279_p6 = scmp.lt.u32.totalorder %s275_s25, %s391_s7 }
 0x1d9   :  { %p281_p7 = pnand %p279_p6, %p276_p5 }
 0x1db   :  { %284 = shalt.err (!%p281_p7)
}
 0x1dc   :  { %225 = dma.vmem_to_hbm [thread:$0]  %s223_s20, 16, %s391_s7, [#allocation4]  }
 0x1dd   :  { %285 = dma.done.wait [#allocation4], 16  }
 0x1de   :  { %286 = vsyncadd [#allocation4], 4294967280 }
 0x1df   :  { %229 = vsyncpa [#allocation4], 1 }

</bundles_post_ra>
